<compile_context>
chip_gen: v6e
topology: v6e:2x2x1
jax: 0.10.0
libtpu: 0.0.40
codegen_flags: <defaults>
</compile_context>

<pallas_src>
import functools
import math

import jax
import jax.numpy as jnp
from jax.experimental import pallas as pl
from jax.experimental.pallas import tpu as pltpu


# ----------------------------- Pallas kernel -------------------------------

def _qknorm_kernel(q_ref, k_ref, qw_ref, kw_ref, qo_ref, ko_ref, *, eps, inv_dh):
    """One row-tile of q and k: RMSNorm over the last (head) dim, cast on store."""

    def _rms(x_ref, w_ref, o_ref):
        x = x_ref[...].astype(jnp.float32)                        # (tM, Dh)
        ms = jnp.sum(x * x, axis=-1, keepdims=True) * inv_dh      # XLU reduce + const mul
        inv = jax.lax.rsqrt(ms + eps)                             # EUP slot
        o_ref[...] = (x * inv * w_ref[...]).astype(o_ref.dtype)

    _rms(q_ref, qw_ref, qo_ref)
    _rms(k_ref, kw_ref, ko_ref)


def _choose_row_tile(m, dh, in_bytes, out_bytes, *,
                     vmem_budget_bytes=12 << 20, hard_cap=2048, min_steps=4):
    """Row tile: VMEM-budgeted, multiple of 8, keeps >= min_steps grid steps
    whenever the row count allows (so v7x's two TCs both get pipelined work)."""
    if m <= 8:
        return m  # full extent is always a legal block dim
    # Double-buffered q/k inputs + q/k outputs per grid step.
    per_row = dh * 2 * (2 * in_bytes + 2 * out_bytes)
    cap = max(8, min(hard_cap, vmem_budget_bytes // max(per_row, 1)))
    t = min(cap, pl.cdiv(m, min_steps))
    t = max(8, (t // 8) * 8)
    return t


def qknorm(q, k, v, q_weight, k_weight, *, eps=None):
    """Pallas QKNorm.  q, k: (..., Dh); v only supplies the output dtype.

    Returns (q_norm, k_norm) with the same shape as q/k and dtype v.dtype.
    """
    assert q.shape == k.shape
    orig_shape = q.shape
    dh = orig_shape[-1]
    m = math.prod(orig_shape[:-1])

    if eps is None:
        # PyTorch nn.RMSNorm(eps=None) uses torch.finfo(input.dtype).eps.
        eps = float(jnp.finfo(q.dtype).eps)

    out_dtype = v.dtype
    in_bytes = jnp.dtype(q.dtype).itemsize
    out_bytes = jnp.dtype(out_dtype).itemsize

    q2 = q.reshape(m, dh)
    k2 = k.reshape(m, dh)
    qw = q_weight.reshape(1, dh).astype(jnp.float32)
    kw = k_weight.reshape(1, dh).astype(jnp.float32)

    tm = _choose_row_tile(m, dh, in_bytes, out_bytes)
    grid = (pl.cdiv(m, tm),)   # ragged last block OK: rows are independent,
                               # out-of-bounds writes are dropped.

    row_spec = pl.BlockSpec((tm, dh), lambda i: (i, 0))
    w_spec = pl.BlockSpec((1, dh), lambda i: (0, 0))

    # Per-step VMEM (double-buffered) + weights, with headroom; 32 MiB covers
    # every generation (<= physical VMEM on v5e/v6e/v7x).
    vmem_limit = 32 << 20

    qo, ko = pl.pallas_call(
        functools.partial(_qknorm_kernel, eps=eps, inv_dh=1.0 / dh),
        out_shape=(
            jax.ShapeDtypeStruct((m, dh), out_dtype),
            jax.ShapeDtypeStruct((m, dh), out_dtype),
        ),
        grid=grid,
        in_specs=[row_spec, row_spec, w_spec, w_spec],
        out_specs=(row_spec, row_spec),
        compiler_params=pltpu.CompilerParams(
            dimension_semantics=("parallel",),
            vmem_limit_bytes=vmem_limit),
    )(q2, k2, qw, kw)

    return qo.reshape(orig_shape), ko.reshape(orig_shape)


# ----------------------------- reference ------------------------------------

def qknorm_ref(q, k, v, q_weight, k_weight, *, eps=None):
    if eps is None:
        eps = float(jnp.finfo(q.dtype).eps)

    def _rms(x, w):
        xf = x.astype(jnp.float32)
        ms = jnp.mean(xf * xf, axis=-1, keepdims=True)
        return xf * jax.lax.rsqrt(ms + eps) * w.astype(jnp.float32)

    return (_rms(q, q_weight).astype(v.dtype),
            _rms(k, k_weight).astype(v.dtype))


# ----------------------------- main ------------------------------------------

if __name__ == "__main__":
    # Small but lane-friendly shapes: head_dim = 128 keeps stores unmasked.
    B, H, L, Dh = 2, 4, 128, 128          # -> 1024 rows, tile = 256, grid = (4,)

    key = jax.random.PRNGKey(0)
    kq, kk, kv, kwq, kwk = jax.random.split(key, 5)
    q = jax.random.normal(kq, (B, H, L, Dh), jnp.float32)
    k = jax.random.normal(kk, (B, H, L, Dh), jnp.float32)
    # v is bf16 so the `.to(v)` dtype-cast semantics of the module are exercised.
    v = jax.random.normal(kv, (B, H, L, Dh), jnp.float32).astype(jnp.bfloat16)
    q_weight = 1.0 + 0.02 * jax.random.normal(kwq, (Dh,), jnp.float32)
    k_weight = 1.0 + 0.02 * jax.random.normal(kwk, (Dh,), jnp.float32)

    fwd = jax.jit(qknorm)
    q_out, k_out = fwd(q, k, v, q_weight, k_weight)
    q_out = jax.block_until_ready(q_out)
    k_out = jax.block_until_ready(k_out)

    assert q_out.shape == (B, H, L, Dh) and k_out.shape == (B, H, L, Dh)
    assert q_out.dtype == v.dtype and k_out.dtype == v.dtype

    q_ref, k_ref = qknorm_ref(q, k, v, q_weight, k_weight)
    assert jnp.allclose(q_out.astype(jnp.float32), q_ref.astype(jnp.float32),
                        rtol=1e-2, atol=1e-2)
    assert jnp.allclose(k_out.astype(jnp.float32), k_ref.astype(jnp.float32),
                        rtol=1e-2, atol=1e-2)
    assert bool(jnp.all(jnp.isfinite(q_out.astype(jnp.float32))))
    assert bool(jnp.all(jnp.isfinite(k_out.astype(jnp.float32))))

    print("KERNEL_OK")
</pallas_src>

<mosaic_0001>
module attributes {stable_mosaic.version = 11 : i64} {
  func.func @_qknorm_kernel(%arg0: i32, %arg1: memref<256x128xf32, #tpu.memory_space<vmem>>, %arg2: memref<256x128xf32, #tpu.memory_space<vmem>>, %arg3: memref<1x128xf32, #tpu.memory_space<vmem>>, %arg4: memref<1x128xf32, #tpu.memory_space<vmem>>, %arg5: memref<256x128xbf16, #tpu.memory_space<vmem>>, %arg6: memref<256x128xbf16, #tpu.memory_space<vmem>>) attributes {dimension_semantics = [#tpu.dimension_semantics<parallel>], iteration_bounds = array<i64: 4>, scalar_prefetch = 0 : i64, scratch_operands = 0 : i64, tpu.core_type = #tpu.core_type<tc>, window_params = [{transform_indices = @transform_0, window_bounds = array<i64: 256, 128>}, {transform_indices = @transform_1, window_bounds = array<i64: 256, 128>}, {pipeline_mode = #tpu.pipeline_mode<synchronous>, transform_indices = @transform_2, window_bounds = array<i64: 1, 128>}, {pipeline_mode = #tpu.pipeline_mode<synchronous>, transform_indices = @transform_3, window_bounds = array<i64: 1, 128>}, {transform_indices = @transform_4, window_bounds = array<i64: 256, 128>}, {transform_indices = @transform_5, window_bounds = array<i64: 256, 128>}]} {
    %c0 = arith.constant 0 : index
    %c0_0 = arith.constant 0 : index
    %0 = vector.load %arg1[%c0, %c0_0] : memref<256x128xf32, #tpu.memory_space<vmem>>, vector<256x128xf32>
    %1 = arith.mulf %0, %0 : vector<256x128xf32>
    %cst = arith.constant dense<0.000000e+00> : vector<256xf32>
    %2 = vector.multi_reduction <add>, %1, %cst [1] : vector<256x128xf32> to vector<256xf32>
    %3 = vector.shape_cast %2 : vector<256xf32> to vector<256x1xf32>
    %cst_1 = arith.constant 7.812500e-03 : f32
    %4 = vector.broadcast %cst_1 : f32 to vector<256x1xf32>
    %5 = arith.mulf %3, %4 : vector<256x1xf32>
    %cst_2 = arith.constant 1.1920929E-7 : f32
    %6 = vector.broadcast %cst_2 : f32 to vector<256x1xf32>
    %7 = arith.addf %5, %6 : vector<256x1xf32>
    %8 = math.rsqrt %7 : vector<256x1xf32>
    %9 = vector.broadcast %8 : vector<256x1xf32> to vector<256x128xf32>
    %10 = arith.mulf %0, %9 : vector<256x128xf32>
    %c0_3 = arith.constant 0 : index
    %c0_4 = arith.constant 0 : index
    %11 = vector.load %arg3[%c0_3, %c0_4] : memref<1x128xf32, #tpu.memory_space<vmem>>, vector<1x128xf32>
    %12 = vector.broadcast %11 : vector<1x128xf32> to vector<256x128xf32>
    %13 = arith.mulf %10, %12 : vector<256x128xf32>
    %14 = arith.truncf %13 : vector<256x128xf32> to vector<256x128xbf16>
    %c0_5 = arith.constant 0 : index
    %c0_6 = arith.constant 0 : index
    %15 = vector.load %arg5[%c0_5, %c0_6] : memref<256x128xbf16, #tpu.memory_space<vmem>>, vector<256x128xbf16>
    tpu.vector_store %arg5[%c0_5, %c0_6], %14 {strides = array<i32>} : memref<256x128xbf16, #tpu.memory_space<vmem>>, vector<256x128xbf16>,
    %c0_7 = arith.constant 0 : index
    %c0_8 = arith.constant 0 : index
    %16 = vector.load %arg2[%c0_7, %c0_8] : memref<256x128xf32, #tpu.memory_space<vmem>>, vector<256x128xf32>
    %17 = arith.mulf %16, %16 : vector<256x128xf32>
    %cst_9 = arith.constant dense<0.000000e+00> : vector<256xf32>
    %18 = vector.multi_reduction <add>, %17, %cst_9 [1] : vector<256x128xf32> to vector<256xf32>
    %19 = vector.shape_cast %18 : vector<256xf32> to vector<256x1xf32>
    %cst_10 = arith.constant 7.812500e-03 : f32
    %20 = vector.broadcast %cst_10 : f32 to vector<256x1xf32>
    %21 = arith.mulf %19, %20 : vector<256x1xf32>
    %cst_11 = arith.constant 1.1920929E-7 : f32
    %22 = vector.broadcast %cst_11 : f32 to vector<256x1xf32>
    %23 = arith.addf %21, %22 : vector<256x1xf32>
    %24 = math.rsqrt %23 : vector<256x1xf32>
    %25 = vector.broadcast %24 : vector<256x1xf32> to vector<256x128xf32>
    %26 = arith.mulf %16, %25 : vector<256x128xf32>
    %c0_12 = arith.constant 0 : index
    %c0_13 = arith.constant 0 : index
    %27 = vector.load %arg4[%c0_12, %c0_13] : memref<1x128xf32, #tpu.memory_space<vmem>>, vector<1x128xf32>
    %28 = vector.broadcast %27 : vector<1x128xf32> to vector<256x128xf32>
    %29 = arith.mulf %26, %28 : vector<256x128xf32>
    %30 = arith.truncf %29 : vector<256x128xf32> to vector<256x128xbf16>
    %c0_14 = arith.constant 0 : index
    %c0_15 = arith.constant 0 : index
    %31 = vector.load %arg6[%c0_14, %c0_15] : memref<256x128xbf16, #tpu.memory_space<vmem>>, vector<256x128xbf16>
    tpu.vector_store %arg6[%c0_14, %c0_15], %30 {strides = array<i32>} : memref<256x128xbf16, #tpu.memory_space<vmem>>, vector<256x128xbf16>,
    return
  }
  func.func @transform_0(%arg0: i32) -> (i32, i32) {
    %c0_i32 = arith.constant 0 : i32
    %c0_i32_0 = arith.constant 0 : i32
    return %arg0, %c0_i32 : i32, i32
  }
  func.func @transform_1(%arg0: i32) -> (i32, i32) {
    %c0_i32 = arith.constant 0 : i32
    %c0_i32_0 = arith.constant 0 : i32
    return %arg0, %c0_i32 : i32, i32
  }
  func.func @transform_2(%arg0: i32) -> (i32, i32) {
    %c0_i32 = arith.constant 0 : i32
    %c0_i32_0 = arith.constant 0 : i32
    %c0_i32_1 = arith.constant 0 : i32
    return %c0_i32, %c0_i32_0 : i32, i32
  }
  func.func @transform_3(%arg0: i32) -> (i32, i32) {
    %c0_i32 = arith.constant 0 : i32
    %c0_i32_0 = arith.constant 0 : i32
    %c0_i32_1 = arith.constant 0 : i32
    return %c0_i32, %c0_i32_0 : i32, i32
  }
  func.func @transform_4(%arg0: i32) -> (i32, i32) {
    %c0_i32 = arith.constant 0 : i32
    %c0_i32_0 = arith.constant 0 : i32
    return %arg0, %c0_i32 : i32, i32
  }
  func.func @transform_5(%arg0: i32) -> (i32, i32) {
    %c0_i32 = arith.constant 0 : i32
    %c0_i32_0 = arith.constant 0 : i32
    return %arg0, %c0_i32 : i32, i32
  }
}

</mosaic_0001>

<bundles_post_ra>
// kernel: qknorm.1
= control target key start
LH: loop header
LB: loop body
LE: loop exit
PB: predicated region body
PF: predicated region fallthrough
CT: control target
= control target key end

     0   :  { %11 = vsyncpa [#allocation3], 0  ;;  %s2828_s0 = inlined_call_operand.hbm [shape: f32[1024,128], index: 0, kind: input, shape index: {}]   ;;  %s2829_s1 = inlined_call_operand.hbm [shape: f32[1024,128], index: 1, kind: input, shape index: {}]   ;;  %s2830_s2 = inlined_call_operand.vmem [shape: f32[1,128], index: 2, kind: input, shape index: {}]   ;;  %s2831_s3 = inlined_call_operand.vmem [shape: f32[1,128], index: 3, kind: input, shape index: {}]   ;;  %s2832_s4 = inlined_call_operand.hbm [shape: bf16[1024,128], index: 4, kind: output, shape index: {0}]   ;;  %s2833_s5 = inlined_call_operand.hbm [shape: bf16[1024,128], index: 5, kind: output, shape index: {1}]  }
   0x1   :  { %13 = vsyncpa [#allocation3 + $0x1], 0 }
   0x2   :  { %14 = vsyncpa [#allocation6], 0 }
   0x3   :  { %16 = vsyncpa [#allocation6 + $0x1], 0 }
   0x4   :  { %17 = vsyncpa [#allocation4], 0 }
   0x5   :  { %19 = vsyncpa [#allocation4 + $0x1], 0 }
   0x6   :  { %20 = vsyncpa [#allocation9], 0 }
   0x7   :  { %22 = vsyncpa [#allocation9 + $0x1], 0  ;;  %s2109_s18 = smov 0   ;;  %s2111_s19 = smov 0  }
   0x8   :  { %s2113_s20 = smov 0   ;;  %s2115_s21 = smov 0  }
   0x9 LB: > { %s2130_s22 = sadd.s32 4294967295, %s2069_s21   ;;  %s1371_s23 = sadd.s32 4294967294, %s2069_s21   ;;  %s2069_s21 = sphi %s2115_s21, %s2877_s21   ;;  %s2065_s20 = sphi %s2113_s20, %s2876_s20   ;;  %s2061_s19 = sphi %s2111_s19, %s2875_s19   ;;  %s2057_s18 = sphi %s2109_s18, %s2874_s18  }
   0xa   : > { %s2134_s24 = sadd.s32 1, %s2069_s21   ;;  %s35_s25 = sadd.s32 1, %s2065_s20 }
   0xb   : > { %s32_s26 = ssub.s32 %s2069_s21, %s2134_s24  ;;  %p42_p0 = scmp.ne.s32.totalorder %s2065_s20, %s2061_s19 }
   0xc   : > { %p33_p1 = scmp.eq.s32.totalorder %s32_s26, 0  ;;  %p43_p2 = scmp.eq.s32.totalorder %s2069_s21, 0 }
   0xd   : > { %p48_p3 = scmp.ne.s32.totalorder %s2061_s19, %s2057_s18  ;;  %p49_p4 = scmp.eq.s32.totalorder %s2130_s22, 0 }
   0xe   : > { %s2146_s27 = scalar_select %p33_p1, %s2065_s20, %s35_s25  }
   0xf   : > { %p2148_p5 = por %p43_p2, %p42_p0  ;;  %p2152_p6 = por %p49_p4, %p48_p3 }
  0x10   : > { %p140_p7 = scmp.eq.s32.totalorder %s2130_s22, 3  ;;  %p146_p8 = scmp.eq.s32.totalorder %s1371_s23, 3 }
  0x11   : > { %s2847_s29 = scalar_select %p2152_p6, 1, 0 }
  0x12   : > { %p1739_p9 = scmp.lt.s32.totalorder %s2069_s21, 4  ;;  %p2158_p10 = por %p140_p7, %p42_p0 }
  0x13   : > { %p2162_p11 = por %p146_p8, %p48_p3  ;;  %s2167_s7 = sand.u32 1, %s2065_s20  }
  0x14   : > { %s2848_s30 = scalar_select %p2158_p10, 1, 0 }
  0x15   : > { %s2849_s6 = scalar_select %p2162_p11, 1, 0 }
  0x16   : > { %s1459_s8 = sshll.u32 %s2069_s21, 12  ;;  %s1374_s9 = sshll.u32 %s2167_s7, 8 }
  0x17   : > { %s2176_s12 = scalar_lea.hbm %s2828_s0, %s1459_s8  ;;  %s202_s13 = scalar_lea.vmem [#allocation2], %s1374_s9 }
  0x18   : > { %s209_s14 = sshll.u32 %s202_s13, 4  ;;  %p2182_p12 = pnand %p1739_p9, %p2148_p5  ;;  %s2186_s14 = int_to_ptr.vmem [resolvable:$true] %s209_s14 }
  0x19   : > { %s199_s16 = scalar_lea.sflag [#allocation3], %s2167_s7  ;;  %s1915_s17 = scalar_lea.hbm %s2176_s12, 4096 }
  0x1a   : > { %p1916_p13 = scmp.ne.s32.totalorder %s2176_s12, %s1915_s17  ;;  %p1917_p0 = pneg %p2182_p12 }
  0x1b   : > { %s1920_s26 = scalar_lea.hbm %s2828_s0, 16384  ;;  %p1921_p3 = scmp.lt.s32.totalorder %s2176_s12, %s2828_s0 }
  0x1c   : > { %p1918_p1 = pnand %p1917_p0, %p1916_p13  ;;  %p1922_p4 = scmp.lt.s32.totalorder %s1920_s26, %s1915_s17 }
  0x1e   : > { %p1919_p2 = pneg %p1918_p1  ;;  %p1923_p5 = por %p1922_p4, %p1921_p3 }
  0x20   : > { %p1924_p7 = pnand %p1923_p5, %p1919_p2 }
  0x22   : > { %1927 = shalt.err (!%p1924_p7)
}
  0x23   : > { %s1928_s11 = scalar_lea.vmem %s2186_s14, 4096  ;;  %s2071_s13 = smov [#allocation2]  }
  0x24   : > { %p1929_p8 = scmp.ne.s32.totalorder %s2186_s14, %s1928_s11  ;;  %s1933_s23 = sshll.u32 %s2071_s13, 4  ;;  %s1934_s23 = int_to_ptr.vmem [resolvable:$false] %s1933_s23 }
  0x25   : > { %s1935_s25 = scalar_lea.vmem %s1934_s23, 8192  ;;  %p1936_p1 = scmp.lt.s32.totalorder %s2186_s14, %s1934_s23 }
  0x26   : > { %p1931_p9 = pnand %p1929_p8, %p1917_p0  ;;  %p1937_p11 = scmp.lt.s32.totalorder %s1935_s25, %s1928_s11 }
  0x28   : > { %p1932_p13 = pneg %p1931_p9  ;;  %p1938_p10 = por %p1937_p11, %p1936_p1 }
  0x2a   : > { %p1939_p3 = pnand %p1938_p10, %p1932_p13 }
  0x2c   : > { %1942 = shalt.err (!%p1939_p3)
}
  0x2d   : > { %s2835_s17 = smov 128   ;;  %s2073_s26 = smov 8  }
  0x2e   : > { %1728 = dma.hbm_to_vmem [thread:$0]  (!%p2182_p12), %s2176_s12, 4096, %s2186_s14, %s199_s16, %s2835_s17, %s2835_s17, %s2073_s26  }
  0x2f   : > { %p1380_p10 = scmp.ge.s32.totalorder %s2069_s21, 1  ;;  %p238_p11 = scmp.lt.s32.totalorder %s2069_s21, 5 }
  0x30   : > { %s2229_s13 = scalar_lea.hbm %s2829_s1, %s1459_s8  ;;  %s223_s23 = scalar_lea.vmem [#allocation5], %s1374_s9 }
  0x31   : > { %p2220_p2 = pnand %p1380_p10, %p238_p11  ;;  %s230_s25 = sshll.u32 %s223_s23, 4  ;;  %s2233_s25 = int_to_ptr.vmem [resolvable:$true] %s230_s25 }
  0x32   : > { %s220_s12 = scalar_lea.sflag [#allocation6], %s2167_s7  ;;  %s1943_s14 = scalar_lea.hbm %s2229_s13, 4096 }
  0x33   : > { %p1944_p4 = scmp.ne.s32.totalorder %s2229_s13, %s1943_s14  ;;  %s1948_s8 = scalar_lea.hbm %s2829_s1, 16384 }
  0x34   : > { %p1949_p8 = scmp.lt.s32.totalorder %s2229_s13, %s2829_s1  ;;  %p1950_p9 = scmp.lt.s32.totalorder %s1948_s8, %s1943_s14 }
  0x35   : > { %p1946_p5 = pnand %p1944_p4, %p1917_p0 }
  0x36   : > { %p1951_p13 = por %p1950_p9, %p1949_p8 }
  0x37   : > { %p1947_p7 = pneg %p1946_p5 }
  0x39   : > { %p1952_p1 = pnand %p1951_p13, %p1947_p7 }
  0x3b   : > { %1955 = shalt.err (!%p1952_p1)
}
  0x3c   : > { %s1956_s7 = scalar_lea.vmem %s2233_s25, 4096  ;;  %s2074_s9 = smov [#allocation5]  }
  0x3d   : > { %p1957_p3 = scmp.ne.s32.totalorder %s2233_s25, %s1956_s7  ;;  %s1961_s17 = sshll.u32 %s2074_s9, 4  ;;  %s1962_s17 = int_to_ptr.vmem [resolvable:$false] %s1961_s17 }
  0x3e   : > { %s1963_s23 = scalar_lea.vmem %s1962_s17, 8192  ;;  %p1964_p4 = scmp.lt.s32.totalorder %s2233_s25, %s1962_s17 }
  0x3f   : > { %p1959_p10 = pnand %p1957_p3, %p1917_p0  ;;  %p1965_p5 = scmp.lt.s32.totalorder %s1963_s23, %s1956_s7 }
  0x41   : > { %p1960_p11 = pneg %p1959_p10  ;;  %p1966_p6 = por %p1965_p5, %p1964_p4 }
  0x43   : > { %p1967_p8 = pnand %p1966_p6, %p1960_p11 }
  0x45   : > { %1970 = shalt.err (!%p1967_p8)
}
  0x46   : > { %s2852_s14 = smov 128   ;;  %242 = sbr.rel (%p2220_p2) target bundleno = 395 (0x18b), region = 36 }
  0x47   : > { %1731 = dma.hbm_to_vmem [thread:$0]  (!%p2182_p12), %s2229_s13, 4096, %s2233_s25, %s220_s12, %s2852_s14, %s2852_s14, %s2073_s26  }
  0x4b   : > { %s2264_s16 = sand.u32 1, %s2061_s19   ;;  %p2853_p6 = scmp.ne.s32.totalorder %s2847_s29, 0 }
  0x4c   : > { %s1381_s8 = sshll.u32 %s2264_s16, 8  ;;  %s245_s10 = scalar_lea.sflag [#allocation3], %s2264_s16 }
  0x4d   : > { %s2268_s11 = scalar_lea.vmem [#allocation2], %s1381_s8 }
  0x4e   : > { %2040 = dma.done.wait (%p2853_p6), %s245_s10, 4096  }
  0x4f   : > { %2042 = vsyncadd (%p2853_p6), %s245_s10, 4294963200  ;;  %s254_s15 = scalar_lea.sflag [#allocation6], %s2264_s16  ;;  %s2275_s26 = scalar_lea.vmem [#allocation5], %s1381_s8 }
  0x50   : > { %2044 = dma.done.wait (%p2853_p6), %s254_s15, 4096  }
  0x51   : > { %2046 = vsyncadd (%p2853_p6), %s254_s15, 4294963200  ;;  %v2282_v0 = vld [vmem:[%s2268_s11 + $0x10] sm:$0xff]  ;;  %v2285_v1 = vld [vmem:[%s2268_s11] sm:$0xff]  ;;  %s1383_s13 = sshll.u32 %s2264_s16, 7  ;;  %s1525_s12 = sshll.u32 %s2130_s22, 11 }
  0x52   : > { %v2288_v2 = vld [vmem:[%s2268_s11 + $0x18] sm:$0xff]  ;;  %v332_v3 = vmul.f32 %v2282_v0, %v2282_v0  ;;  %v330_v4 = vmul.f32 %v2285_v1, %v2285_v1  ;;  %v2295_v5 = vld [vmem:[%s2268_s11 + $0x8] sm:$0xff]  ;;  %v2305_v9 = vld [vmem:[%s2268_s11 + $0x20] sm:$0xff]  ;;  %s2579_s25 = scalar_lea.vmem [#allocation7], %s1383_s13  ;;  %s2663_s8 = scalar_lea.hbm %s2832_s4, %s1525_s12 }
  0x53   : > { %v333_v6 = vmul.f32 %v2288_v2, %v2288_v2  ;;  %v331_v7 = vmul.f32 %v2295_v5, %v2295_v5  ;;  %v2302_v8 = vld [vmem:[%s2268_s11 + $0x28] sm:$0xff]  ;;  %v334_v11 = vmul.f32 %v2305_v9, %v2305_v9  ;;  %v2312_v12 = vld [vmem:[%s2268_s11 + $0x38] sm:$0xff]  ;;  %v2315_v13 = vld [vmem:[%s2268_s11 + $0x30] sm:$0xff]  ;;  %s1227_s7 = sshll.u32 %s2579_s25, 4  ;;  %s1209_s10 = scalar_lea.sflag [#allocation4], %s2264_s16  ;;  %s2665_s7 = int_to_ptr.vmem [resolvable:$true] %s1227_s7 }
  0x54   : > { %366 = vadd.xlane.f32.xlu1 %v332_v3  ;;  %362 = vadd.xlane.f32.xlu0 %v330_v4  ;;  %v335_v10 = vmul.f32 %v2302_v8, %v2302_v8  ;;  %v337_v14 = vmul.f32 %v2312_v12, %v2312_v12  ;;  %v336_v15 = vmul.f32 %v2315_v13, %v2315_v13  ;;  %v2322_v16 = vld [vmem:[%s2268_s11 + $0x48] sm:$0xff]  ;;  %v2325_v17 = vld [vmem:[%s2268_s11 + $0x40] sm:$0xff]  ;;  %v2332_v20 = vld [vmem:[%s2268_s11 + $0x58] sm:$0xff]  ;;  %p2863_p0 = scmp.ne.s32.totalorder %s2848_s30, 0  ;;  %s2075_s15 = smov [#allocation7]  }
  0x55   : > { %v339_v18 = vmul.f32 %v2322_v16, %v2322_v16  ;;  %v338_v19 = vmul.f32 %v2325_v17, %v2325_v17  ;;  %v2335_v21 = vld [vmem:[%s2268_s11 + $0x50] sm:$0xff]  ;;  %v341_v22 = vmul.f32 %v2332_v20, %v2332_v20  ;;  %v2342_v24 = vld [vmem:[%s2268_s11 + $0x68] sm:$0xff]  ;;  %v2345_v25 = vld [vmem:[%s2268_s11 + $0x60] sm:$0xff]  ;;  %s1975_s29 = sshll.u32 %s2075_s15, 4  ;;  %s1976_s29 = int_to_ptr.vmem [resolvable:$false] %s1975_s29 }
  0x56   : > { %v340_v23 = vmul.f32 %v2335_v21, %v2335_v21  ;;  %v343_v26 = vmul.f32 %v2342_v24, %v2342_v24  ;;  %v342_v27 = vmul.f32 %v2345_v25, %v2345_v25  ;;  %v2352_v28 = vld [vmem:[%s2268_s11 + $0x78] sm:$0xff]  ;;  %v2355_v29 = vld [vmem:[%s2268_s11 + $0x70] sm:$0xff]  ;;  %v2362_v32 = vld [vmem:[%s2268_s11 + $0x88] sm:$0xff]  ;;  %s1977_s28 = scalar_lea.vmem %s1976_s29, 4096  ;;  %p1978_p9 = scmp.lt.s32.totalorder %s2665_s7, %s1976_s29 }
  0x57   : > { %v345_v30 = vmul.f32 %v2352_v28, %v2352_v28  ;;  %v344_v31 = vmul.f32 %v2355_v29, %v2355_v29  ;;  %v2365_v33 = vld [vmem:[%s2268_s11 + $0x80] sm:$0xff]  ;;  %v347_v34 = vmul.f32 %v2362_v32, %v2362_v32  ;;  %v2372_v36 = vld [vmem:[%s2268_s11 + $0x98] sm:$0xff]  ;;  %v2375_v37 = vld [vmem:[%s2268_s11 + $0x90] sm:$0xff] }
  0x58   : > { %368 = vadd.xlane.f32.xlu1 %v333_v6  ;;  %364 = vadd.xlane.f32.xlu0 %v331_v7  ;;  %v346_v35 = vmul.f32 %v2365_v33, %v2365_v33  ;;  %v349_v38 = vmul.f32 %v2372_v36, %v2372_v36  ;;  %v348_v39 = vmul.f32 %v2375_v37, %v2375_v37  ;;  %v2382_v40 = vld [vmem:[%s2268_s11 + $0xa8] sm:$0xff]  ;;  %v2385_v41 = vld [vmem:[%s2268_s11 + $0xa0] sm:$0xff]  ;;  %v2392_v44 = vld [vmem:[%s2268_s11 + $0xb8] sm:$0xff] }
  0x59   : > { %v351_v42 = vmul.f32 %v2382_v40, %v2382_v40  ;;  %v350_v43 = vmul.f32 %v2385_v41, %v2385_v41  ;;  %v2395_v45 = vld [vmem:[%s2268_s11 + $0xb0] sm:$0xff]  ;;  %v353_v46 = vmul.f32 %v2392_v44, %v2392_v44  ;;  %v2402_v48 = vld [vmem:[%s2268_s11 + $0xc8] sm:$0xff]  ;;  %v2405_v49 = vld [vmem:[%s2268_s11 + $0xc0] sm:$0xff] }
  0x5a   : > { %v352_v47 = vmul.f32 %v2395_v45, %v2395_v45  ;;  %v355_v50 = vmul.f32 %v2402_v48, %v2402_v48  ;;  %v354_v51 = vmul.f32 %v2405_v49, %v2405_v49  ;;  %v2412_v52 = vld [vmem:[%s2268_s11 + $0xd8] sm:$0xff]  ;;  %v2415_v53 = vld [vmem:[%s2268_s11 + $0xd0] sm:$0xff]  ;;  %v2422_v56 = vld [vmem:[%s2268_s11 + $0xe8] sm:$0xff] }
  0x5b   : > { %v357_v54 = vmul.f32 %v2412_v52, %v2412_v52  ;;  %v356_v55 = vmul.f32 %v2415_v53, %v2415_v53  ;;  %v2425_v57 = vld [vmem:[%s2268_s11 + $0xe0] sm:$0xff]  ;;  %v359_v58 = vmul.f32 %v2422_v56, %v2422_v56  ;;  %v2432_v60 = vld [vmem:[%s2268_s11 + $0xf8] sm:$0xff]  ;;  %v2435_v61 = vld [vmem:[%s2268_s11 + $0xf0] sm:$0xff]  ;;  %s1971_s11 = scalar_lea.vmem %s2665_s7, 2048 }
  0x5c   : > { %372 = vadd.xlane.f32.xlu1 %v335_v10  ;;  %370 = vadd.xlane.f32.xlu0 %v334_v11  ;;  %v358_v59 = vmul.f32 %v2425_v57, %v2425_v57  ;;  %v361_v62 = vmul.f32 %v2432_v60, %v2432_v60  ;;  %v360_v63 = vmul.f32 %v2435_v61, %v2435_v61  ;;  %v2442_v3 = vld [vmem:[%s2275_s26 + $0x8] sm:$0xff]  ;;  %v2445_v4 = vld [vmem:[%s2275_s26] sm:$0xff]  ;;  %v2452_v10 = vld [vmem:[%s2275_s26 + $0x18] sm:$0xff]  ;;  %p1972_p12 = scmp.ne.s32.totalorder %s2665_s7, %s1971_s11  ;;  %p1979_p13 = scmp.lt.s32.totalorder %s1977_s28, %s1971_s11 }
  0x5d   : > { %v786_v6 = vmul.f32 %v2442_v3, %v2442_v3  ;;  %v785_v7 = vmul.f32 %v2445_v4, %v2445_v4  ;;  %v2455_v11 = vld [vmem:[%s2275_s26 + $0x10] sm:$0xff] }
  0x5e   : > { %p1973_p2 = pnand %p1972_p12, %p2863_p0  ;;  %p1980_p1 = por %p1979_p13, %p1978_p9 }
  0x60   : > { %376 = vadd.xlane.f32.xlu1 %v337_v14  ;;  %374 = vadd.xlane.f32.xlu0 %v336_v15  ;;  %v788_v14 = vmul.f32 %v2452_v10, %v2452_v10  ;;  %v787_v15 = vmul.f32 %v2455_v11, %v2455_v11  ;;  %p1974_p7 = pneg %p1973_p2 }
  0x62   : > { %p1981_p3 = pnand %p1980_p1, %p1974_p7 }
  0x64   : > { %380 = vadd.xlane.f32.xlu1 %v339_v18  ;;  %378 = vadd.xlane.f32.xlu0 %v338_v19  ;;  %v2462_v18 = vld [vmem:[%s2275_s26 + $0x28] sm:$0xff]  ;;  %v2465_v19 = vld [vmem:[%s2275_s26 + $0x20] sm:$0xff] }
  0x68   : > { %384 = vadd.xlane.f32.xlu1 %v341_v22  ;;  %382 = vadd.xlane.f32.xlu0 %v340_v23  ;;  %v790_v22 = vmul.f32 %v2462_v18, %v2462_v18  ;;  %v789_v23 = vmul.f32 %v2465_v19, %v2465_v19 }
  0x6c   : > { %388 = vadd.xlane.f32.xlu1 %v343_v26  ;;  %386 = vadd.xlane.f32.xlu0 %v342_v27  ;;  %v2472_v26 = vld [vmem:[%s2275_s26 + $0x38] sm:$0xff]  ;;  %v2475_v27 = vld [vmem:[%s2275_s26 + $0x30] sm:$0xff] }
  0x70   : > { %392 = vadd.xlane.f32.xlu1 %v345_v30  ;;  %390 = vadd.xlane.f32.xlu0 %v344_v31  ;;  %v792_v30 = vmul.f32 %v2472_v26, %v2472_v26  ;;  %v791_v31 = vmul.f32 %v2475_v27, %v2475_v27 }
  0x74   : > { %396 = vadd.xlane.f32.xlu1 %v347_v34  ;;  %394 = vadd.xlane.f32.xlu0 %v346_v35  ;;  %v2482_v34 = vld [vmem:[%s2275_s26 + $0x48] sm:$0xff]  ;;  %v2485_v35 = vld [vmem:[%s2275_s26 + $0x40] sm:$0xff] }
  0x78   : > { %400 = vadd.xlane.f32.xlu1 %v349_v38  ;;  %398 = vadd.xlane.f32.xlu0 %v348_v39  ;;  %v794_v38 = vmul.f32 %v2482_v34, %v2482_v34  ;;  %v793_v39 = vmul.f32 %v2485_v35, %v2485_v35 }
  0x7c   : > { %404 = vadd.xlane.f32.xlu1 %v351_v42  ;;  %402 = vadd.xlane.f32.xlu0 %v350_v43  ;;  %v2492_v42 = vld [vmem:[%s2275_s26 + $0x58] sm:$0xff]  ;;  %v2495_v43 = vld [vmem:[%s2275_s26 + $0x50] sm:$0xff] }
  0x80   : > { %408 = vadd.xlane.f32.xlu1 %v353_v46  ;;  %406 = vadd.xlane.f32.xlu0 %v352_v47  ;;  %v796_v46 = vmul.f32 %v2492_v42, %v2492_v42  ;;  %v795_v47 = vmul.f32 %v2495_v43, %v2495_v43 }
  0x84   : > { %412 = vadd.xlane.f32.xlu1 %v355_v50  ;;  %410 = vadd.xlane.f32.xlu0 %v354_v51  ;;  %v2502_v50 = vld [vmem:[%s2275_s26 + $0x68] sm:$0xff]  ;;  %v2505_v51 = vld [vmem:[%s2275_s26 + $0x60] sm:$0xff] }
  0x85   : > { %2854 = vst [vmem:[#allocation14_spill] sm:$0xff] %v2505_v51 }
  0x88   : > { %416 = vadd.xlane.f32.xlu1 %v357_v54  ;;  %414 = vadd.xlane.f32.xlu0 %v356_v55  ;;  %v798_v54 = vmul.f32 %v2502_v50, %v2502_v50  ;;  %v797_v55 = vmul.f32 %v2505_v51, %v2505_v51 }
  0x8c   : > { %420 = vadd.xlane.f32.xlu1 %v359_v58  ;;  %418 = vadd.xlane.f32.xlu0 %v358_v59  ;;  %v2512_v58 = vld [vmem:[%s2275_s26 + $0x78] sm:$0xff]  ;;  %v2515_v59 = vld [vmem:[%s2275_s26 + $0x70] sm:$0xff] }
  0x8d   : > { %2855 = vst [vmem:[#allocation15_spill] sm:$0xff] %v2512_v58  ;;  %2856 = vst [vmem:[#allocation16_spill] sm:$0xff] %v2515_v59 }
  0x90   : > { %424 = vadd.xlane.f32.xlu1 %v361_v62  ;;  %422 = vadd.xlane.f32.xlu0 %v360_v63  ;;  %v800_v62 = vmul.f32 %v2512_v58, %v2512_v58  ;;  %v799_v63 = vmul.f32 %v2515_v59, %v2515_v59 }
  0x94   : > { %819 = vadd.xlane.f32.xlu1 %v786_v6  ;;  %817 = vadd.xlane.f32.xlu0 %v785_v7  ;;  %v2522_v6 = vld [vmem:[%s2275_s26 + $0x88] sm:$0xff]  ;;  %v2525_v7 = vld [vmem:[%s2275_s26 + $0x80] sm:$0xff] }
  0x95   : > { %2857 = vst [vmem:[#allocation17_spill] sm:$0xff] %v2522_v6  ;;  %2858 = vst [vmem:[#allocation18_spill] sm:$0xff] %v2525_v7 }
  0x98   : > { %823 = vadd.xlane.f32.xlu1 %v788_v14  ;;  %821 = vadd.xlane.f32.xlu0 %v787_v15  ;;  %v802_v14 = vmul.f32 %v2522_v6, %v2522_v6  ;;  %v801_v15 = vmul.f32 %v2525_v7, %v2525_v7  ;;  %v781_v7 = vld [vmem:[%s2275_s26 + $0xe0] sm:$0xff]  ;;  %v783_v6 = vld [vmem:[%s2275_s26 + $0xf0] sm:$0xff] }
  0x9c   : > { %827 = vadd.xlane.f32.xlu1 %v790_v22  ;;  %825 = vadd.xlane.f32.xlu0 %v789_v23  ;;  %v2532_v22 = vld [vmem:[%s2275_s26 + $0x98] sm:$0xff]  ;;  %v2535_v23 = vld [vmem:[%s2275_s26 + $0x90] sm:$0xff] }
  0x9d   : > { %2859 = vst [vmem:[#allocation19_spill] sm:$0xff] %v2532_v22  ;;  %2860 = vst [vmem:[#allocation20_spill] sm:$0xff] %v2535_v23 }
  0xa0   : > { %831 = vadd.xlane.f32.xlu1 %v792_v30  ;;  %829 = vadd.xlane.f32.xlu0 %v791_v31  ;;  %v804_v30 = vmul.f32 %v2532_v22, %v2532_v22  ;;  %v803_v31 = vmul.f32 %v2535_v23, %v2535_v23  ;;  %v779_v23 = vld [vmem:[%s2275_s26 + $0xd0] sm:$0xff] }
  0xa1   : > { %v811_v22 = vmul.f32 %v779_v23, %v779_v23 }
  0xa4   : > { %835 = vadd.xlane.f32.xlu1 %v794_v38  ;;  %833 = vadd.xlane.f32.xlu0 %v793_v39  ;;  %v2542_v38 = vld [vmem:[%s2275_s26 + $0xa8] sm:$0xff]  ;;  %v2545_v39 = vld [vmem:[%s2275_s26 + $0xa0] sm:$0xff] }
  0xa5   : > { %2861 = vst [vmem:[#allocation21_spill] sm:$0xff] %v2542_v38  ;;  %2862 = vst [vmem:[#allocation22_spill] sm:$0xff] %v2545_v39 }
  0xa8   : > { %839 = vadd.xlane.f32.xlu1 %v796_v46  ;;  %837 = vadd.xlane.f32.xlu0 %v795_v47  ;;  %v806_v46 = vmul.f32 %v2542_v38, %v2542_v38  ;;  %v805_v47 = vmul.f32 %v2545_v39, %v2545_v39  ;;  %v780_v38 = vld [vmem:[%s2275_s26 + $0xd8] sm:$0xff] }
  0xa9   : > { %v812_v39 = vmul.f32 %v780_v38, %v780_v38 }
  0xac   : > { %843 = vadd.xlane.f32.xlu1 %v798_v54  ;;  %841 = vadd.xlane.f32.xlu0 %v797_v55  ;;  %v776_v54 = vld [vmem:[%s2275_s26 + $0xb8] sm:$0xff]  ;;  %v775_v55 = vld [vmem:[%s2275_s26 + $0xb0] sm:$0xff] }
  0xb0   : > { %847 = vadd.xlane.f32.xlu1 %v800_v62  ;;  %845 = vadd.xlane.f32.xlu0 %v799_v63  ;;  %v808_v62 = vmul.f32 %v776_v54, %v776_v54  ;;  %v807_v63 = vmul.f32 %v775_v55, %v775_v55  ;;  %v813_v54 = vmul.f32 %v781_v7, %v781_v7  ;;  %v784_v55 = vld [vmem:[%s2275_s26 + $0xf8] sm:$0xff] }
  0xb4   : > { %851 = vadd.xlane.f32.xlu1 %v802_v14  ;;  %849 = vadd.xlane.f32.xlu0 %v801_v15  ;;  %v778_v14 = vld [vmem:[%s2275_s26 + $0xc8] sm:$0xff]  ;;  %v777_v15 = vld [vmem:[%s2275_s26 + $0xc0] sm:$0xff] }
  0xb8   : > { %855 = vadd.xlane.f32.xlu1 %v804_v30  ;;  %853 = vadd.xlane.f32.xlu0 %v803_v31  ;;  %v810_v30 = vmul.f32 %v778_v14, %v778_v14  ;;  %v809_v31 = vmul.f32 %v777_v15, %v777_v15 }
  0xbc   : > { %859 = vadd.xlane.f32.xlu1 %v806_v46  ;;  %857 = vadd.xlane.f32.xlu0 %v805_v47  ;;  %v782_v46 = vld [vmem:[%s2275_s26 + $0xe8] sm:$0xff] }
  0xbd   : > { %v814_v47 = vmul.f32 %v782_v46, %v782_v46 }
  0xc0   : > { %863 = vadd.xlane.f32.xlu1 %v808_v62  ;;  %861 = vadd.xlane.f32.xlu0 %v807_v63  ;;  %v816_v62 = vmul.f32 %v784_v55, %v784_v55  ;;  %v815_v63 = vmul.f32 %v783_v6, %v783_v6 }
  0xc4   : > { %867 = vadd.xlane.f32.xlu1 %v810_v30  ;;  %865 = vadd.xlane.f32.xlu0 %v809_v31 }
  0xc8   : > { %871 = vadd.xlane.f32.xlu1 %v812_v39  ;;  %869 = vadd.xlane.f32.xlu0 %v811_v22 }
  0xcc   : > { %875 = vadd.xlane.f32.xlu1 %v814_v47  ;;  %873 = vadd.xlane.f32.xlu0 %v813_v54 }
  0xd0   : > { %879 = vadd.xlane.f32.xlu1 %v816_v62  ;;  %877 = vadd.xlane.f32.xlu0 %v815_v63 }
  0xdd   : > { %v367_v14 = vpop.xlane.xlu1 %366  ;;  %v363_v15 = vpop.xlane.xlu0 %362 }
  0xde   : > { %v428_v30 = vmul.f32 0.0078125, %v367_v14  ;;  %v426_v31 = vmul.f32 0.0078125, %v363_v15 }
  0xe0   : > { %v460_v38 = vadd.f32 1.1920929e-07, %v428_v30  ;;  %v458_v23 = vadd.f32 1.1920929e-07, %v426_v31 }
  0xe1   : > { %v369_v59 = vpop.xlane.xlu1 %368  ;;  %v365_v58 = vpop.xlane.xlu0 %364 }
  0xe2   : > { %1777 = vrsqrt.f32 %v460_v38  ;;  %v429_v22 = vmul.f32 0.0078125, %v369_v59  ;;  %v427_v39 = vmul.f32 0.0078125, %v365_v58 }
  0xe3   : > { %1779 = vrsqrt.f32 %v458_v23 }
  0xe4   : > { %v461_v7 = vadd.f32 1.1920929e-07, %v429_v22  ;;  %v459_v46 = vadd.f32 1.1920929e-07, %v427_v39 }
  0xe5   : > { %v373_v47 = vpop.xlane.xlu1 %372  ;;  %v371_v54 = vpop.xlane.xlu0 %370 }
  0xe6   : > { %1781 = vrsqrt.f32 %v461_v7  ;;  %v431_v6 = vmul.f32 0.0078125, %v373_v47  ;;  %v430_v55 = vmul.f32 0.0078125, %v371_v54 }
  0xe7   : > { %1783 = vrsqrt.f32 %v459_v46 }
  0xe8   : > { %v463_v62 = vadd.f32 1.1920929e-07, %v431_v6  ;;  %v462_v63 = vadd.f32 1.1920929e-07, %v430_v55 }
  0xe9   : > { %v377_v14 = vpop.xlane.xlu1 %376  ;;  %v375_v15 = vpop.xlane.xlu0 %374 }
  0xea   : > { %1785 = vrsqrt.f32 %v463_v62  ;;  %v433_v30 = vmul.f32 0.0078125, %v377_v14  ;;  %v432_v31 = vmul.f32 0.0078125, %v375_v15  ;;  %v2565_v62 = vld [vmem:[%s2830_s2] ss:$0 sm:$0xff] }
  0xeb   : > { %1787 = vrsqrt.f32 %v462_v63 }
  0xec   : > { %v465_v38 = vadd.f32 1.1920929e-07, %v433_v30  ;;  %v464_v59 = vadd.f32 1.1920929e-07, %v432_v31 }
  0xed   : > { %v381_v58 = vpop.xlane.xlu1 %380  ;;  %v379_v23 = vpop.xlane.xlu0 %378 }
  0xee   : > { %1789 = vrsqrt.f32 %v465_v38  ;;  %v435_v22 = vmul.f32 0.0078125, %v381_v58  ;;  %v434_v39 = vmul.f32 0.0078125, %v379_v23 }
  0xef   : > { %v1778_v51 = vpop.eup %1777  ;;  %1791 = vrsqrt.f32 %v464_v59 }
  0xf0   : > { %v1780_v7 = vpop.eup %1779  ;;  %v467_v46 = vadd.f32 1.1920929e-07, %v435_v22  ;;  %v466_v47 = vadd.f32 1.1920929e-07, %v434_v39  ;;  %v524_v54 = vmul.f32 %v1778_v51, %v2282_v0 }
  0xf1   : > { %v385_v6 = vpop.xlane.xlu1 %384  ;;  %v383_v55 = vpop.xlane.xlu0 %382  ;;  %v522_v30 = vmul.f32 %v1780_v7, %v2285_v1 }
  0xf2   : > { %1793 = vrsqrt.f32 %v467_v46  ;;  %v437_v63 = vmul.f32 0.0078125, %v385_v6  ;;  %v436_v14 = vmul.f32 0.0078125, %v383_v55  ;;  %v563_v51 = vmul.f32 %v2565_v62, %v524_v54 }
  0xf3   : > { %v1782_v15 = vpop.eup %1781  ;;  %1795 = vrsqrt.f32 %v466_v47  ;;  %v561_v7 = vmul.f32 %v2565_v62, %v522_v30 }
  0xf4   : > { %v1784_v31 = vpop.eup %1783  ;;  %v525_v38 = vmul.f32 %v1782_v15, %v2288_v2  ;;  %v469_v59 = vadd.f32 1.1920929e-07, %v437_v63  ;;  %v468_v0 = vadd.f32 1.1920929e-07, %v436_v14 }
  0xf5   : > { %v523_v58 = vmul.f32 %v1784_v31, %v2295_v5  ;;  %v389_v23 = vpop.xlane.xlu1 %388  ;;  %v387_v22 = vpop.xlane.xlu0 %386 }
  0xf6   : > { %v564_v39 = vmul.f32 %v2565_v62, %v525_v38  ;;  %1797 = vrsqrt.f32 %v469_v59  ;;  %v439_v46 = vmul.f32 0.0078125, %v389_v23  ;;  %v438_v6 = vmul.f32 0.0078125, %v387_v22 }
  0xf7   : > { %v1786_v1 = vpop.eup %1785  ;;  %v562_v47 = vmul.f32 %v2565_v62, %v523_v58  ;;  %1799 = vrsqrt.f32 %v468_v0 }
  0xf8   : > { %v1788_v2 = vpop.eup %1787  ;;  %v1535_v55 = vpack.c.bf16 %v564_v39, %v563_v51  ;;  %v527_v54 = vmul.f32 %v1786_v1, %v2302_v8  ;;  %v471_v63 = vadd.f32 1.1920929e-07, %v439_v46  ;;  %v470_v5 = vadd.f32 1.1920929e-07, %v438_v6 }
  0xf9   : > { %v1530_v14 = vpack.c.bf16 %v562_v47, %v561_v7  ;;  %v526_v15 = vmul.f32 %v1788_v2, %v2305_v9  ;;  %v393_v31 = vpop.xlane.xlu1 %392  ;;  %v391_v38 = vpop.xlane.xlu0 %390 }
  0xfa   : > { %1687 = vst [vmem:[%s2579_s25 + $0x8] sm:$0xff] %v1535_v55   ;;  %v566_v30 = vmul.f32 %v2565_v62, %v527_v54  ;;  %1801 = vrsqrt.f32 %v471_v63  ;;  %v441_v59 = vmul.f32 0.0078125, %v393_v31  ;;  %v440_v0 = vmul.f32 0.0078125, %v391_v38 }
  0xfb   : > { %v1790_v51 = vpop.eup %1789  ;;  %1531 = vst [vmem:[%s2579_s25] sm:$0xff] %v1530_v14   ;;  %v565_v8 = vmul.f32 %v2565_v62, %v526_v15  ;;  %1803 = vrsqrt.f32 %v470_v5 }
  0xfc   : > { %v1792_v9 = vpop.eup %1791  ;;  %v529_v58 = vmul.f32 %v1790_v51, %v2312_v12  ;;  %v473_v23 = vadd.f32 1.1920929e-07, %v441_v59  ;;  %v472_v22 = vadd.f32 1.1920929e-07, %v440_v0 }
  0xfd   : > { %v1540_v39 = vpack.c.bf16 %v566_v30, %v565_v8  ;;  %v528_v46 = vmul.f32 %v1792_v9, %v2315_v13  ;;  %v397_v6 = vpop.xlane.xlu1 %396  ;;  %v395_v1 = vpop.xlane.xlu0 %394 }
  0xfe   : > { %v568_v7 = vmul.f32 %v2565_v62, %v529_v58  ;;  %1805 = vrsqrt.f32 %v473_v23  ;;  %v443_v47 = vmul.f32 0.0078125, %v397_v6  ;;  %v442_v2 = vmul.f32 0.0078125, %v395_v1 }
  0xff   : > { %v1794_v55 = vpop.eup %1793  ;;  %1688 = vst [vmem:[%s2579_s25 + $0x10] sm:$0xff] %v1540_v39   ;;  %v567_v54 = vmul.f32 %v2565_v62, %v528_v46  ;;  %1807 = vrsqrt.f32 %v472_v22 }
 0x100   : > { %v1796_v63 = vpop.eup %1795  ;;  %v531_v12 = vmul.f32 %v1794_v55, %v2322_v16  ;;  %v475_v5 = vadd.f32 1.1920929e-07, %v443_v47  ;;  %v474_v14 = vadd.f32 1.1920929e-07, %v442_v2 }
 0x101   : > { %v1545_v15 = vpack.c.bf16 %v568_v7, %v567_v54  ;;  %v530_v13 = vmul.f32 %v1796_v63, %v2325_v17  ;;  %v401_v31 = vpop.xlane.xlu1 %400  ;;  %v399_v38 = vpop.xlane.xlu0 %398 }
 0x102   : > { %v570_v30 = vmul.f32 %v2565_v62, %v531_v12  ;;  %1809 = vrsqrt.f32 %v475_v5  ;;  %v445_v59 = vmul.f32 0.0078125, %v401_v31  ;;  %v444_v0 = vmul.f32 0.0078125, %v399_v38 }
 0x103   : > { %v1798_v51 = vpop.eup %1797  ;;  %1689 = vst [vmem:[%s2579_s25 + $0x18] sm:$0xff] %v1545_v15   ;;  %v569_v8 = vmul.f32 %v2565_v62, %v530_v13  ;;  %1811 = vrsqrt.f32 %v474_v14 }
 0x104   : > { %v1800_v9 = vpop.eup %1799  ;;  %v533_v16 = vmul.f32 %v1798_v51, %v2332_v20  ;;  %v477_v58 = vadd.f32 1.1920929e-07, %v445_v59  ;;  %v476_v23 = vadd.f32 1.1920929e-07, %v444_v0 }
 0x105   : > { %v1550_v22 = vpack.c.bf16 %v570_v30, %v569_v8  ;;  %v532_v17 = vmul.f32 %v1800_v9, %v2335_v21  ;;  %v405_v39 = vpop.xlane.xlu1 %404  ;;  %v403_v46 = vpop.xlane.xlu0 %402 }
 0x106   : > { %v572_v6 = vmul.f32 %v2565_v62, %v533_v16  ;;  %1813 = vrsqrt.f32 %v477_v58  ;;  %v447_v1 = vmul.f32 0.0078125, %v405_v39  ;;  %v446_v7 = vmul.f32 0.0078125, %v403_v46 }
 0x107   : > { %v1802_v47 = vpop.eup %1801  ;;  %1690 = vst [vmem:[%s2579_s25 + $0x20] sm:$0xff] %v1550_v22   ;;  %v571_v2 = vmul.f32 %v2565_v62, %v532_v17  ;;  %1815 = vrsqrt.f32 %v476_v23 }
 0x108   : > { %v1804_v55 = vpop.eup %1803  ;;  %v535_v20 = vmul.f32 %v1802_v47, %v2342_v24  ;;  %v479_v54 = vadd.f32 1.1920929e-07, %v447_v1  ;;  %v478_v63 = vadd.f32 1.1920929e-07, %v446_v7 }
 0x109   : > { %v1555_v12 = vpack.c.bf16 %v572_v6, %v571_v2  ;;  %v534_v21 = vmul.f32 %v1804_v55, %v2345_v25  ;;  %v409_v5 = vpop.xlane.xlu1 %408  ;;  %v407_v14 = vpop.xlane.xlu0 %406 }
 0x10a   : > { %v574_v15 = vmul.f32 %v2565_v62, %v535_v20  ;;  %1817 = vrsqrt.f32 %v479_v54  ;;  %v449_v13 = vmul.f32 0.0078125, %v409_v5  ;;  %v448_v31 = vmul.f32 0.0078125, %v407_v14 }
 0x10b   : > { %v1806_v38 = vpop.eup %1805  ;;  %1691 = vst [vmem:[%s2579_s25 + $0x28] sm:$0xff] %v1555_v12   ;;  %v573_v30 = vmul.f32 %v2565_v62, %v534_v21  ;;  %1819 = vrsqrt.f32 %v478_v63 }
 0x10c   : > { %v1808_v59 = vpop.eup %1807  ;;  %v537_v24 = vmul.f32 %v1806_v38, %v2352_v28  ;;  %v481_v0 = vadd.f32 1.1920929e-07, %v449_v13  ;;  %v480_v51 = vadd.f32 1.1920929e-07, %v448_v31 }
 0x10d   : > { %v1560_v8 = vpack.c.bf16 %v574_v15, %v573_v30  ;;  %v536_v25 = vmul.f32 %v1808_v59, %v2355_v29  ;;  %v413_v9 = vpop.xlane.xlu1 %412  ;;  %v411_v16 = vpop.xlane.xlu0 %410 }
 0x10e   : > { %v576_v58 = vmul.f32 %v2565_v62, %v537_v24  ;;  %1821 = vrsqrt.f32 %v481_v0  ;;  %v451_v23 = vmul.f32 0.0078125, %v413_v9  ;;  %v450_v22 = vmul.f32 0.0078125, %v411_v16 }
 0x10f   : > { %v1810_v17 = vpop.eup %1809  ;;  %1692 = vst [vmem:[%s2579_s25 + $0x30] sm:$0xff] %v1560_v8   ;;  %v575_v39 = vmul.f32 %v2565_v62, %v536_v25  ;;  %1823 = vrsqrt.f32 %v480_v51 }
 0x110   : > { %v1812_v46 = vpop.eup %1811  ;;  %v539_v28 = vmul.f32 %v1810_v17, %v2362_v32  ;;  %v483_v6 = vadd.f32 1.1920929e-07, %v451_v23  ;;  %v482_v1 = vadd.f32 1.1920929e-07, %v450_v22 }
 0x111   : > { %v1565_v7 = vpack.c.bf16 %v576_v58, %v575_v39  ;;  %v538_v29 = vmul.f32 %v1812_v46, %v2365_v33  ;;  %v417_v47 = vpop.xlane.xlu1 %416  ;;  %v415_v2 = vpop.xlane.xlu0 %414 }
 0x112   : > { %v578_v55 = vmul.f32 %v2565_v62, %v539_v28  ;;  %1825 = vrsqrt.f32 %v483_v6  ;;  %v453_v20 = vmul.f32 0.0078125, %v417_v47  ;;  %v452_v54 = vmul.f32 0.0078125, %v415_v2 }
 0x113   : > { %v1814_v63 = vpop.eup %1813  ;;  %1693 = vst [vmem:[%s2579_s25 + $0x38] sm:$0xff] %v1565_v7   ;;  %v577_v12 = vmul.f32 %v2565_v62, %v538_v29  ;;  %1827 = vrsqrt.f32 %v482_v1 }
 0x114   : > { %v1816_v21 = vpop.eup %1815  ;;  %v541_v32 = vmul.f32 %v1814_v63, %v2372_v36  ;;  %v485_v5 = vadd.f32 1.1920929e-07, %v453_v20  ;;  %v484_v14 = vadd.f32 1.1920929e-07, %v452_v54 }
 0x115   : > { %v1570_v15 = vpack.c.bf16 %v578_v55, %v577_v12  ;;  %v540_v33 = vmul.f32 %v1816_v21, %v2375_v37  ;;  %v421_v13 = vpop.xlane.xlu1 %420  ;;  %v419_v31 = vpop.xlane.xlu0 %418 }
 0x116   : > { %v580_v38 = vmul.f32 %v2565_v62, %v541_v32  ;;  %1829 = vrsqrt.f32 %v485_v5  ;;  %v455_v30 = vmul.f32 0.0078125, %v421_v13  ;;  %v454_v59 = vmul.f32 0.0078125, %v419_v31 }
 0x117   : > { %v1818_v24 = vpop.eup %1817  ;;  %1694 = vst [vmem:[%s2579_s25 + $0x40] sm:$0xff] %v1570_v15   ;;  %v579_v0 = vmul.f32 %v2565_v62, %v540_v33  ;;  %1831 = vrsqrt.f32 %v484_v14 }
 0x118   : > { %v1820_v51 = vpop.eup %1819  ;;  %v543_v36 = vmul.f32 %v1818_v24, %v2382_v40  ;;  %v487_v8 = vadd.f32 1.1920929e-07, %v455_v30  ;;  %v486_v25 = vadd.f32 1.1920929e-07, %v454_v59 }
 0x119   : > { %v1575_v9 = vpack.c.bf16 %v580_v38, %v579_v0  ;;  %v542_v37 = vmul.f32 %v1820_v51, %v2385_v41  ;;  %v425_v16 = vpop.xlane.xlu1 %424  ;;  %v423_v58 = vpop.xlane.xlu0 %422 }
 0x11a   : > { %v582_v23 = vmul.f32 %v2565_v62, %v543_v36  ;;  %1833 = vrsqrt.f32 %v487_v8  ;;  %v457_v22 = vmul.f32 0.0078125, %v425_v16  ;;  %v456_v17 = vmul.f32 0.0078125, %v423_v58 }
 0x11b   : > { %v1822_v39 = vpop.eup %1821  ;;  %1695 = vst [vmem:[%s2579_s25 + $0x48] sm:$0xff] %v1575_v9   ;;  %v581_v46 = vmul.f32 %v2565_v62, %v542_v37  ;;  %1835 = vrsqrt.f32 %v486_v25 }
 0x11c   : > { %v1824_v28 = vpop.eup %1823  ;;  %v545_v40 = vmul.f32 %v1822_v39, %v2392_v44  ;;  %v489_v6 = vadd.f32 1.1920929e-07, %v457_v22  ;;  %v488_v1 = vadd.f32 1.1920929e-07, %v456_v17 }
 0x11d   : > { %v1580_v7 = vpack.c.bf16 %v582_v23, %v581_v46  ;;  %v544_v41 = vmul.f32 %v1824_v28, %v2395_v45  ;;  %v820_v29 = vpop.xlane.xlu1 %819  ;;  %v818_v47 = vpop.xlane.xlu0 %817 }
 0x11e   : > { %v584_v2 = vmul.f32 %v2565_v62, %v545_v40  ;;  %1837 = vrsqrt.f32 %v489_v6  ;;  %v882_v55 = vmul.f32 0.0078125, %v820_v29  ;;  %v881_v20 = vmul.f32 0.0078125, %v818_v47 }
 0x11f   : > { %v1826_v54 = vpop.eup %1825  ;;  %1696 = vst [vmem:[%s2579_s25 + $0x50] sm:$0xff] %v1580_v7   ;;  %v583_v63 = vmul.f32 %v2565_v62, %v544_v41  ;;  %1839 = vrsqrt.f32 %v488_v1 }
 0x120   : > { %v1828_v12 = vpop.eup %1827  ;;  %v547_v44 = vmul.f32 %v1826_v54, %v2402_v48  ;;  %v914_v21 = vadd.f32 1.1920929e-07, %v882_v55  ;;  %v913_v32 = vadd.f32 1.1920929e-07, %v881_v20 }
 0x121   : > { %v1585_v5 = vpack.c.bf16 %v584_v2, %v583_v63  ;;  %v546_v45 = vmul.f32 %v1828_v12, %v2405_v49  ;;  %v824_v14 = vpop.xlane.xlu1 %823  ;;  %v822_v15 = vpop.xlane.xlu0 %821 }
 0x122   : > { %v586_v33 = vmul.f32 %v2565_v62, %v547_v44  ;;  %1841 = vrsqrt.f32 %v914_v21  ;;  %v884_v13 = vmul.f32 0.0078125, %v824_v14  ;;  %v883_v31 = vmul.f32 0.0078125, %v822_v15 }
 0x123   : > { %v1830_v38 = vpop.eup %1829  ;;  %1697 = vst [vmem:[%s2579_s25 + $0x58] sm:$0xff] %v1585_v5   ;;  %v585_v30 = vmul.f32 %v2565_v62, %v546_v45  ;;  %1843 = vrsqrt.f32 %v913_v32 }
 0x124   : > { %v1832_v59 = vpop.eup %1831  ;;  %v549_v48 = vmul.f32 %v1830_v38, %v2412_v52  ;;  %v916_v24 = vadd.f32 1.1920929e-07, %v884_v13  ;;  %v915_v0 = vadd.f32 1.1920929e-07, %v883_v31 }
 0x125   : > { %v1590_v51 = vpack.c.bf16 %v586_v33, %v585_v30  ;;  %v548_v49 = vmul.f32 %v1832_v59, %v2415_v53  ;;  %v828_v36 = vpop.xlane.xlu1 %827  ;;  %v826_v8 = vpop.xlane.xlu0 %825 }
 0x126   : > { %v588_v25 = vmul.f32 %v2565_v62, %v549_v48  ;;  %1845 = vrsqrt.f32 %v916_v24  ;;  %v886_v9 = vmul.f32 0.0078125, %v828_v36  ;;  %v885_v37 = vmul.f32 0.0078125, %v826_v8 }
 0x127   : > { %v1834_v16 = vpop.eup %1833  ;;  %1698 = vst [vmem:[%s2579_s25 + $0x60] sm:$0xff] %v1590_v51   ;;  %v587_v58 = vmul.f32 %v2565_v62, %v548_v49  ;;  %1847 = vrsqrt.f32 %v915_v0 }
 0x128   : > { %v1836_v23 = vpop.eup %1835  ;;  %v551_v52 = vmul.f32 %v1834_v16, %v2422_v56  ;;  %v918_v22 = vadd.f32 1.1920929e-07, %v886_v9  ;;  %v917_v17 = vadd.f32 1.1920929e-07, %v885_v37 }
 0x129   : > { %v1595_v39 = vpack.c.bf16 %v588_v25, %v587_v58  ;;  %v550_v53 = vmul.f32 %v1836_v23, %v2425_v57  ;;  %v832_v46 = vpop.xlane.xlu1 %831  ;;  %v830_v28 = vpop.xlane.xlu0 %829 }
 0x12a   : > { %v590_v40 = vmul.f32 %v2565_v62, %v551_v52  ;;  %1849 = vrsqrt.f32 %v918_v22  ;;  %v888_v6 = vmul.f32 0.0078125, %v832_v46  ;;  %v887_v1 = vmul.f32 0.0078125, %v830_v28 }
 0x12b   : > { %v1838_v7 = vpop.eup %1837  ;;  %1699 = vst [vmem:[%s2579_s25 + $0x68] sm:$0xff] %v1595_v39   ;;  %v589_v41 = vmul.f32 %v2565_v62, %v550_v53  ;;  %1851 = vrsqrt.f32 %v917_v17 }
 0x12c   : > { %v1840_v56 = vpop.eup %1839  ;;  %v553_v29 = vmul.f32 %v1838_v7, %v2432_v60  ;;  %v920_v47 = vadd.f32 1.1920929e-07, %v888_v6  ;;  %v919_v57 = vadd.f32 1.1920929e-07, %v887_v1  ;;  %v2655_v60 = vld [vmem:[%s2831_s3] ss:$0 sm:$0xff] }
 0x12d   : > { %v1600_v2 = vpack.c.bf16 %v590_v40, %v589_v41  ;;  %v552_v55 = vmul.f32 %v1840_v56, %v2435_v61  ;;  %v836_v20 = vpop.xlane.xlu1 %835  ;;  %v834_v54 = vpop.xlane.xlu0 %833 }
 0x12e   : > { %v592_v63 = vmul.f32 %v2565_v62, %v553_v29  ;;  %1853 = vrsqrt.f32 %v920_v47  ;;  %v890_v12 = vmul.f32 0.0078125, %v836_v20  ;;  %v889_v44 = vmul.f32 0.0078125, %v834_v54 }
 0x12f   : > { %v1842_v21 = vpop.eup %1841  ;;  %1700 = vst [vmem:[%s2579_s25 + $0x70] sm:$0xff] %v1600_v2   ;;  %v591_v32 = vmul.f32 %v2565_v62, %v552_v55  ;;  %1855 = vrsqrt.f32 %v919_v57 }
 0x130   : > { %v1844_v61 = vpop.eup %1843  ;;  %v978_v5 = vmul.f32 %v1842_v21, %v2442_v3  ;;  %v922_v45 = vadd.f32 1.1920929e-07, %v890_v12  ;;  %v921_v14 = vadd.f32 1.1920929e-07, %v889_v44 }
 0x131   : > { %v1605_v62 = vpack.c.bf16 %v592_v63, %v591_v32  ;;  %v977_v15 = vmul.f32 %v1844_v61, %v2445_v4  ;;  %v840_v33 = vpop.xlane.xlu1 %839  ;;  %v838_v13 = vpop.xlane.xlu0 %837 }
 0x132   : > { %v1017_v3 = vmul.f32 %v2655_v60, %v978_v5  ;;  %1857 = vrsqrt.f32 %v922_v45  ;;  %v892_v31 = vmul.f32 0.0078125, %v840_v33  ;;  %v891_v38 = vmul.f32 0.0078125, %v838_v13 }
 0x133   : > { %v1846_v30 = vpop.eup %1845  ;;  %1701 = vst [vmem:[%s2579_s25 + $0x78] sm:$0xff] %v1605_v62   ;;  %v1016_v59 = vmul.f32 %v2655_v60, %v977_v15  ;;  %1859 = vrsqrt.f32 %v921_v14 }
 0x134   : > { %v1848_v48 = vpop.eup %1847  ;;  %v980_v24 = vmul.f32 %v1846_v30, %v2452_v10  ;;  %v924_v4 = vadd.f32 1.1920929e-07, %v892_v31  ;;  %v923_v0 = vadd.f32 1.1920929e-07, %v891_v38 }
 0x135   : > { %1984 = shalt.err (!%p1981_p3)
}
 0x136   : > { %s1985_s25 = scalar_lea.hbm %s2663_s8, 2048  ;;  %s1989_s23 = scalar_lea.hbm %s2832_s4, 8192 }
 0x137   : > { %p1986_p10 = scmp.ne.s32.totalorder %s2663_s8, %s1985_s25  ;;  %p1990_p5 = scmp.lt.s32.totalorder %s2663_s8, %s2832_s4 }
 0x138   : > { %p1991_p8 = scmp.lt.s32.totalorder %s1989_s23, %s1985_s25 }
 0x139   : > { %p1987_p11 = pnand %p1986_p10, %p2863_p0 }
 0x13a   : > { %p1992_p6 = por %p1991_p8, %p1990_p5 }
 0x13b   : > { %p1988_p4 = pneg %p1987_p11 }
 0x13d   : > { %p1993_p12 = pnand %p1992_p6, %p1988_p4 }
 0x13f   : > { %1996 = shalt.err (!%p1993_p12)
}
 0x140   : > { %s2076_s11 = smov 64   ;;  %s2077_s29 = smov 4   ;;  %v1610_v10 = vpack.c.bf16 %v1017_v3, %v1016_v59  ;;  %v979_v51 = vmul.f32 %v1848_v48, %v2455_v11  ;;  %v844_v49 = vpop.xlane.xlu1 %843  ;;  %v842_v36 = vpop.xlane.xlu0 %841  ;;  %v1019_v8 = vmul.f32 %v2655_v60, %v980_v24  ;;  %1861 = vrsqrt.f32 %v924_v4 }
 0x141   : > { %1721 = dma.vmem_to_hbm [thread:$0]  (%p2863_p0), %s2665_s7, 2048, %s2663_s8, %s1209_s10, %s2076_s11, %s2076_s11, %s2077_s29   ;;  %v894_v25 = vmul.f32 0.0078125, %v844_v49  ;;  %v893_v9 = vmul.f32 0.0078125, %v842_v36  ;;  %v1850_v37 = vpop.eup %1849  ;;  %1863 = vrsqrt.f32 %v923_v0 }
 0x142   : > { %s2702_s28 = scalar_lea.vmem [#allocation8], %s1383_s13  ;;  %v1018_v16 = vmul.f32 %v2655_v60, %v979_v51  ;;  %v1852_v58 = vpop.eup %1851  ;;  %v982_v11 = vmul.f32 %v1850_v37, %v2462_v18  ;;  %s2782_s10 = scalar_lea.hbm %s2833_s5, %s1525_s12 }
 0x143   : > { %1611 = vst [vmem:[%s2702_s28] sm:$0xff] %v1610_v10   ;;  %v926_v23 = vadd.f32 1.1920929e-07, %v894_v25  ;;  %v925_v52 = vadd.f32 1.1920929e-07, %v893_v9  ;;  %v981_v17 = vmul.f32 %v1852_v58, %v2465_v19  ;;  %v1854_v6 = vpop.eup %1853  ;;  %s1243_s13 = sshll.u32 %s2702_s28, 4  ;;  %s2078_s9 = smov [#allocation8]   ;;  %s2784_s13 = int_to_ptr.vmem [resolvable:$true] %s1243_s13 }
 0x144   : > { %v1615_v22 = vpack.c.bf16 %v1019_v8, %v1018_v16  ;;  %v848_v39 = vpop.xlane.xlu1 %847  ;;  %v846_v53 = vpop.xlane.xlu0 %845  ;;  %v1021_v46 = vmul.f32 %v2655_v60, %v982_v11  ;;  %v984_v18 = vmul.f32 %v1854_v6, %v2472_v26  ;;  %s1997_s25 = scalar_lea.vmem %s2784_s13, 2048  ;;  %s2001_s17 = sshll.u32 %s2078_s9, 4  ;;  %s2002_s17 = int_to_ptr.vmem [resolvable:$false] %s2001_s17 }
 0x145   : > { %1865 = vrsqrt.f32 %v926_v23  ;;  %v896_v28 = vmul.f32 0.0078125, %v848_v39  ;;  %v895_v40 = vmul.f32 0.0078125, %v846_v53  ;;  %v1020_v1 = vmul.f32 %v2655_v60, %v981_v17  ;;  %v1856_v7 = vpop.eup %1855  ;;  %p1998_p2 = scmp.ne.s32.totalorder %s2784_s13, %s1997_s25  ;;  %s2003_s22 = scalar_lea.vmem %s2002_s17, 4096 }
 0x146   : > { %1702 = vst [vmem:[%s2702_s28 + $0x8] sm:$0xff] %v1615_v22   ;;  %1867 = vrsqrt.f32 %v925_v52  ;;  %v983_v19 = vmul.f32 %v1856_v7, %v2475_v27  ;;  %v1023_v2 = vmul.f32 %v2655_v60, %v984_v18  ;;  %v1858_v54 = vpop.eup %1857  ;;  %p2004_p13 = scmp.lt.s32.totalorder %s2784_s13, %s2002_s17  ;;  %p2005_p1 = scmp.lt.s32.totalorder %s2003_s22, %s1997_s25 }
 0x147   : > { %v928_v41 = vadd.f32 1.1920929e-07, %v896_v28  ;;  %v927_v56 = vadd.f32 1.1920929e-07, %v895_v40  ;;  %v1620_v29 = vpack.c.bf16 %v1021_v46, %v1020_v1  ;;  %v1860_v12 = vpop.eup %1859  ;;  %v986_v26 = vmul.f32 %v1858_v54, %v2482_v34  ;;  %v2866_v28 = vld [vmem:[#allocation16_spill] sm:$0xff]  ;;  %v2868_v54 = vld [vmem:[#allocation18_spill] sm:$0xff]  ;;  %p1999_p7 = pnand %p1998_p2, %p2863_p0 }
 0x148   : > { %v852_v47 = vpop.xlane.xlu1 %851  ;;  %v850_v57 = vpop.xlane.xlu0 %849  ;;  %v1022_v63 = vmul.f32 %v2655_v60, %v983_v19  ;;  %v985_v27 = vmul.f32 %v1860_v12, %v2485_v35  ;;  %p2006_p3 = por %p2005_p1, %p2004_p13 }
 0x149   : > { %1869 = vrsqrt.f32 %v928_v41  ;;  %v898_v55 = vmul.f32 0.0078125, %v852_v47  ;;  %v897_v20 = vmul.f32 0.0078125, %v850_v57  ;;  %1703 = vst [vmem:[%s2702_s28 + $0x10] sm:$0xff] %v1620_v29   ;;  %v1025_v45 = vmul.f32 %v2655_v60, %v986_v26  ;;  %v2867_v47 = vld [vmem:[#allocation17_spill] sm:$0xff]  ;;  %p2000_p9 = pneg %p1999_p7 }
 0x14a   : > { %1871 = vrsqrt.f32 %v927_v56  ;;  %v1625_v32 = vpack.c.bf16 %v1023_v2, %v1022_v63  ;;  %v1024_v33 = vmul.f32 %v2655_v60, %v985_v27 }
 0x14b   : > { %v930_v44 = vadd.f32 1.1920929e-07, %v898_v55  ;;  %v929_v21 = vadd.f32 1.1920929e-07, %v897_v20  ;;  %p2007_p10 = pnand %p2006_p3, %p2000_p9 }
 0x14c   : > { %v856_v61 = vpop.xlane.xlu1 %855  ;;  %v854_v5 = vpop.xlane.xlu0 %853  ;;  %1704 = vst [vmem:[%s2702_s28 + $0x18] sm:$0xff] %v1625_v32   ;;  %v1630_v38 = vpack.c.bf16 %v1025_v45, %v1024_v33  ;;  %v2869_v45 = vld [vmem:[#allocation19_spill] sm:$0xff] }
 0x14d   : > { %1873 = vrsqrt.f32 %v930_v44  ;;  %v900_v14 = vmul.f32 0.0078125, %v856_v61  ;;  %v899_v62 = vmul.f32 0.0078125, %v854_v5  ;;  %v1862_v15 = vpop.eup %1861 }
 0x14e   : > { %1875 = vrsqrt.f32 %v929_v21  ;;  %v1864_v13 = vpop.eup %1863  ;;  %v988_v34 = vmul.f32 %v1862_v15, %v2492_v42  ;;  %1705 = vst [vmem:[%s2702_s28 + $0x20] sm:$0xff] %v1630_v38  }
 0x14f   : > { %v932_v3 = vadd.f32 1.1920929e-07, %v900_v14  ;;  %v931_v31 = vadd.f32 1.1920929e-07, %v899_v62  ;;  %v987_v35 = vmul.f32 %v1864_v13, %v2495_v43  ;;  %v2864_v43 = vld [vmem:[#allocation14_spill] sm:$0xff]  ;;  %v2870_v13 = vld [vmem:[#allocation20_spill] sm:$0xff] }
 0x150   : > { %v860_v30 = vpop.xlane.xlu1 %859  ;;  %v858_v59 = vpop.xlane.xlu0 %857  ;;  %v1027_v48 = vmul.f32 %v2655_v60, %v988_v34 }
 0x151   : > { %1877 = vrsqrt.f32 %v932_v3  ;;  %v902_v24 = vmul.f32 0.0078125, %v860_v30  ;;  %v901_v4 = vmul.f32 0.0078125, %v858_v59  ;;  %v1026_v10 = vmul.f32 %v2655_v60, %v987_v35 }
 0x152   : > { %v1866_v0 = vpop.eup %1865  ;;  %1879 = vrsqrt.f32 %v931_v31 }
 0x153   : > { %v1868_v51 = vpop.eup %1867  ;;  %v990_v42 = vmul.f32 %v1866_v0, %v2502_v50  ;;  %v934_v49 = vadd.f32 1.1920929e-07, %v902_v24  ;;  %v933_v36 = vadd.f32 1.1920929e-07, %v901_v4  ;;  %v1635_v8 = vpack.c.bf16 %v1027_v48, %v1026_v10  ;;  %v2865_v50 = vld [vmem:[#allocation15_spill] sm:$0xff]  ;;  %v2871_v4 = vld [vmem:[#allocation21_spill] sm:$0xff] }
 0x154   : > { %v989_v25 = vmul.f32 %v1868_v51, %v2864_v43  ;;  %v864_v9 = vpop.xlane.xlu1 %863  ;;  %v862_v37 = vpop.xlane.xlu0 %861 }
 0x155   : > { %v1029_v16 = vmul.f32 %v2655_v60, %v990_v42  ;;  %1881 = vrsqrt.f32 %v934_v49  ;;  %v904_v58 = vmul.f32 0.0078125, %v864_v9  ;;  %v903_v11 = vmul.f32 0.0078125, %v862_v37  ;;  %1706 = vst [vmem:[%s2702_s28 + $0x28] sm:$0xff] %v1635_v8   ;;  %v2872_v49 = vld [vmem:[#allocation22_spill] sm:$0xff] }
 0x156   : > { %v1870_v23 = vpop.eup %1869  ;;  %v1028_v52 = vmul.f32 %v2655_v60, %v989_v25  ;;  %1883 = vrsqrt.f32 %v933_v36 }
 0x157   : > { %v1872_v22 = vpop.eup %1871  ;;  %v992_v17 = vmul.f32 %v1870_v23, %v2865_v50  ;;  %v936_v39 = vadd.f32 1.1920929e-07, %v904_v58  ;;  %v935_v53 = vadd.f32 1.1920929e-07, %v903_v11  ;;  %v1905_v23 = vld [vmem:[%s2275_s26 + $0xb8] sm:$0xff] }
 0x158   : > { %v1640_v46 = vpack.c.bf16 %v1029_v16, %v1028_v52  ;;  %v991_v40 = vmul.f32 %v1872_v22, %v2866_v28  ;;  %v868_v6 = vpop.xlane.xlu1 %867  ;;  %v866_v1 = vpop.xlane.xlu0 %865 }
 0x159   : > { %v1031_v7 = vmul.f32 %v2655_v60, %v992_v17  ;;  %1885 = vrsqrt.f32 %v936_v39  ;;  %v906_v18 = vmul.f32 0.0078125, %v868_v6  ;;  %v905_v41 = vmul.f32 0.0078125, %v866_v1  ;;  %v1906_v39 = vld [vmem:[%s2275_s26 + $0xb0] sm:$0xff]  ;;  %v1907_v1 = vld [vmem:[%s2275_s26 + $0xc8] sm:$0xff] }
 0x15a   : > { %v1874_v56 = vpop.eup %1873  ;;  %1707 = vst [vmem:[%s2702_s28 + $0x30] sm:$0xff] %v1640_v46   ;;  %v1030_v29 = vmul.f32 %v2655_v60, %v991_v40  ;;  %1887 = vrsqrt.f32 %v935_v53 }
 0x15b   : > { %v1876_v19 = vpop.eup %1875  ;;  %v994_v57 = vmul.f32 %v1874_v56, %v2867_v47  ;;  %v938_v2 = vadd.f32 1.1920929e-07, %v906_v18  ;;  %v937_v55 = vadd.f32 1.1920929e-07, %v905_v41  ;;  %v1908_v41 = vld [vmem:[%s2275_s26 + $0xc0] sm:$0xff] }
 0x15c   : > { %v1645_v20 = vpack.c.bf16 %v1031_v7, %v1030_v29  ;;  %v993_v63 = vmul.f32 %v1876_v19, %v2868_v54  ;;  %v872_v12 = vpop.xlane.xlu1 %871  ;;  %v870_v26 = vpop.xlane.xlu0 %869  ;;  %v1910_v54 = vld [vmem:[%s2275_s26 + $0xd0] sm:$0xff] }
 0x15d   : > { %v1033_v44 = vmul.f32 %v2655_v60, %v994_v57  ;;  %1889 = vrsqrt.f32 %v938_v2  ;;  %v908_v21 = vmul.f32 0.0078125, %v872_v12  ;;  %v907_v32 = vmul.f32 0.0078125, %v870_v26  ;;  %v1909_v2 = vld [vmem:[%s2275_s26 + $0xd8] sm:$0xff] }
 0x15e   : > { %v1878_v27 = vpop.eup %1877  ;;  %1708 = vst [vmem:[%s2702_s28 + $0x38] sm:$0xff] %v1645_v20   ;;  %v1032_v61 = vmul.f32 %v2655_v60, %v993_v63  ;;  %1891 = vrsqrt.f32 %v937_v55 }
 0x15f   : > { %v1880_v5 = vpop.eup %1879  ;;  %v996_v14 = vmul.f32 %v1878_v27, %v2869_v45  ;;  %v940_v62 = vadd.f32 1.1920929e-07, %v908_v21  ;;  %v939_v15 = vadd.f32 1.1920929e-07, %v907_v32  ;;  %v1911_v32 = vld [vmem:[%s2275_s26 + $0xe8] sm:$0xff] }
 0x160   : > { %v1650_v33 = vpack.c.bf16 %v1033_v44, %v1032_v61  ;;  %v995_v34 = vmul.f32 %v1880_v5, %v2870_v13  ;;  %v876_v3 = vpop.xlane.xlu1 %875  ;;  %v874_v31 = vpop.xlane.xlu0 %873  ;;  %v1912_v5 = vld [vmem:[%s2275_s26 + $0xe0] sm:$0xff]  ;;  %v1913_v13 = vld [vmem:[%s2275_s26 + $0xf8] sm:$0xff] }
 0x161   : > { %v1035_v38 = vmul.f32 %v2655_v60, %v996_v14  ;;  %1893 = vrsqrt.f32 %v940_v62  ;;  %v910_v35 = vmul.f32 0.0078125, %v876_v3  ;;  %v909_v30 = vmul.f32 0.0078125, %v874_v31  ;;  %v1914_v31 = vld [vmem:[%s2275_s26 + $0xf0] sm:$0xff]  ;;  %s1214_s26 = scalar_lea.sflag [#allocation9], %s2264_s16 }
 0x162   : > { %v1882_v59 = vpop.eup %1881  ;;  %1709 = vst [vmem:[%s2702_s28 + $0x40] sm:$0xff] %v1650_v33   ;;  %v1034_v48 = vmul.f32 %v2655_v60, %v995_v34  ;;  %1895 = vrsqrt.f32 %v939_v15 }
 0x163   : > { %v1884_v24 = vpop.eup %1883  ;;  %v998_v0 = vmul.f32 %v1882_v59, %v2871_v4  ;;  %v942_v10 = vadd.f32 1.1920929e-07, %v910_v35  ;;  %v941_v51 = vadd.f32 1.1920929e-07, %v909_v30 }
 0x164   : > { %v1655_v42 = vpack.c.bf16 %v1035_v38, %v1034_v48  ;;  %v997_v36 = vmul.f32 %v1884_v24, %v2872_v49  ;;  %v880_v8 = vpop.xlane.xlu1 %879  ;;  %v878_v43 = vpop.xlane.xlu0 %877 }
 0x165   : > { %v1037_v25 = vmul.f32 %v2655_v60, %v998_v0  ;;  %1897 = vrsqrt.f32 %v942_v10  ;;  %v912_v9 = vmul.f32 0.0078125, %v880_v8  ;;  %v911_v37 = vmul.f32 0.0078125, %v878_v43 }
 0x166   : > { %v1886_v16 = vpop.eup %1885  ;;  %1710 = vst [vmem:[%s2702_s28 + $0x48] sm:$0xff] %v1655_v42   ;;  %v1036_v58 = vmul.f32 %v2655_v60, %v997_v36  ;;  %1899 = vrsqrt.f32 %v941_v51 }
 0x167   : > { %v1888_v11 = vpop.eup %1887  ;;  %v1000_v52 = vmul.f32 %v1905_v23, %v1886_v16  ;;  %v944_v22 = vadd.f32 1.1920929e-07, %v912_v9  ;;  %v943_v50 = vadd.f32 1.1920929e-07, %v911_v37 }
 0x168   : > { %v1660_v17 = vpack.c.bf16 %v1037_v25, %v1036_v58  ;;  %v999_v53 = vmul.f32 %v1906_v39, %v1888_v11 }
 0x169   : > { %v1039_v46 = vmul.f32 %v2655_v60, %v1000_v52  ;;  %1901 = vrsqrt.f32 %v944_v22 }
 0x16a   : > { %v1890_v28 = vpop.eup %1889  ;;  %1711 = vst [vmem:[%s2702_s28 + $0x50] sm:$0xff] %v1660_v17   ;;  %v1038_v40 = vmul.f32 %v2655_v60, %v999_v53  ;;  %1903 = vrsqrt.f32 %v943_v50 }
 0x16b   : > { %v1892_v6 = vpop.eup %1891  ;;  %v1002_v7 = vmul.f32 %v1907_v1, %v1890_v28 }
 0x16c   : > { %v1665_v18 = vpack.c.bf16 %v1039_v46, %v1038_v40  ;;  %v1001_v56 = vmul.f32 %v1908_v41, %v1892_v6 }
 0x16d   : > { %v1041_v29 = vmul.f32 %v2655_v60, %v1002_v7 }
 0x16e   : > { %v1894_v19 = vpop.eup %1893  ;;  %1712 = vst [vmem:[%s2702_s28 + $0x58] sm:$0xff] %v1665_v18   ;;  %v1040_v47 = vmul.f32 %v2655_v60, %v1001_v56 }
 0x16f   : > { %v1896_v57 = vpop.eup %1895  ;;  %v1004_v55 = vmul.f32 %v1909_v2, %v1894_v19 }
 0x170   : > { %v1670_v20 = vpack.c.bf16 %v1041_v29, %v1040_v47  ;;  %v1003_v63 = vmul.f32 %v1910_v54, %v1896_v57 }
 0x171   : > { %v1043_v12 = vmul.f32 %v2655_v60, %v1004_v55 }
 0x172   : > { %v1898_v26 = vpop.eup %1897  ;;  %1713 = vst [vmem:[%s2702_s28 + $0x60] sm:$0xff] %v1670_v20   ;;  %v1042_v44 = vmul.f32 %v2655_v60, %v1003_v63 }
 0x173   : > { %v1900_v21 = vpop.eup %1899  ;;  %v1006_v27 = vmul.f32 %v1911_v32, %v1898_v26 }
 0x174   : > { %v1675_v61 = vpack.c.bf16 %v1043_v12, %v1042_v44  ;;  %v1005_v45 = vmul.f32 %v1912_v5, %v1900_v21 }
 0x175   : > { %v1045_v14 = vmul.f32 %v2655_v60, %v1006_v27 }
 0x176   : > { %v1902_v62 = vpop.eup %1901  ;;  %1714 = vst [vmem:[%s2702_s28 + $0x68] sm:$0xff] %v1675_v61   ;;  %v1044_v15 = vmul.f32 %v2655_v60, %v1005_v45 }
 0x177   : > { %v1904_v33 = vpop.eup %1903  ;;  %v1008_v34 = vmul.f32 %v1913_v13, %v1902_v62 }
 0x178   : > { %v1680_v3 = vpack.c.bf16 %v1045_v14, %v1044_v15  ;;  %v1007_v38 = vmul.f32 %v1914_v31, %v1904_v33 }
 0x179   : > { %v1047_v35 = vmul.f32 %v2655_v60, %v1008_v34 }
 0x17a   : > { %1715 = vst [vmem:[%s2702_s28 + $0x70] sm:$0xff] %v1680_v3   ;;  %v1046_v30 = vmul.f32 %v2655_v60, %v1007_v38 }
 0x17c   : > { %v1685_v59 = vpack.c.bf16 %v1047_v35, %v1046_v30 }
 0x17e   : > { %1716 = vst [vmem:[%s2702_s28 + $0x78] sm:$0xff] %v1685_v59  }
 0x17f   : > { %2010 = shalt.err (!%p2007_p10)
}
 0x180   : > { %s2011_s12 = scalar_lea.hbm %s2782_s10, 2048  ;;  %s2015_s14 = scalar_lea.hbm %s2833_s5, 8192 }
 0x181   : > { %p2012_p11 = scmp.ne.s32.totalorder %s2782_s10, %s2011_s12  ;;  %p2016_p8 = scmp.lt.s32.totalorder %s2782_s10, %s2833_s5 }
 0x182   : > { %p2017_p6 = scmp.lt.s32.totalorder %s2015_s14, %s2011_s12 }
 0x183   : > { %p2013_p4 = pnand %p2012_p11, %p2863_p0 }
 0x184   : > { %p2018_p12 = por %p2017_p6, %p2016_p8 }
 0x185   : > { %p2014_p5 = pneg %p2013_p4 }
 0x187   : > { %p2019_p2 = pnand %p2018_p12, %p2014_p5 }
 0x189   : > { %2022 = shalt.err (!%p2019_p2)
}
 0x18a   : > { %1722 = dma.vmem_to_hbm [thread:$0]  (%p2863_p0), %s2784_s13, 2048, %s2782_s10, %s1214_s26, %s2076_s11, %s2076_s11, %s2077_s29  }
 0x18b PF: > { %p1740_p7 = scmp.ge.s32.totalorder %s2069_s21, 2  ;;  %s1258_s7 = sand.u32 1, %s2057_s18  }
 0x18c   : > { %p2873_p9 = scmp.ne.s32.totalorder %s2849_s6, 0  ;;  %s1259_s8 = scalar_lea.sflag [#allocation4], %s1258_s7 }
 0x18e   : > { %p1733_p13 = pnand %p1740_p7, %p2873_p9 }
 0x190   : > { %p1734_p1 = pneg %p1733_p13 }
 0x192   : > { %2048 = dma.done.wait (%p1734_p1), %s1259_s8, 2048  }
 0x193   : > { %2050 = vsyncadd (%p1734_p1), %s1259_s8, 4294965248  ;;  %s1268_s25 = scalar_lea.sflag [#allocation9], %s1258_s7 }
 0x194   : > { %2052 = dma.done.wait (%p1734_p1), %s1268_s25, 2048  }
 0x195   : > { %2054 = vsyncadd (%p1734_p1), %s1268_s25, 4294965248  ;;  %p25_p0 = scmp.ge.s32.totalorder %s2134_s24, 6   ;;  %s2874_s18 = smov %s2061_s19 }
 0x196   : > { %s2875_s19 = smov %s2065_s20  ;;  %s2876_s20 = smov %s2146_s27 }
 0x197   : > { %s2877_s21 = smov %s2134_s24  ;;  %27 = sbr.rel (!%p25_p0) target bundleno = 9 (0x9), region = 111 }
 0x19c   :  { %1273 = vsyncpa [#allocation3], 1 }
 0x19d   :  { %1275 = vsyncpa [#allocation3 + $0x1], 1 }
 0x19e   :  { %1276 = vsyncpa [#allocation6], 1 }
 0x19f   :  { %1278 = vsyncpa [#allocation6 + $0x1], 1 }
 0x1a0   :  { %1279 = vsyncpa [#allocation4], 1 }
 0x1a1   :  { %1281 = vsyncpa [#allocation4 + $0x1], 1 }
 0x1a2   :  { %1282 = vsyncpa [#allocation9], 1 }
 0x1a3   :  { %1284 = vsyncpa [#allocation9 + $0x1], 1 }

</bundles_post_ra>
